<compile_context>
chip_gen: v7x
topology: tpu7x:2x2x1
jax: 0.10.0
libtpu: 0.0.40
codegen_flags: <defaults>
</compile_context>

<pallas_src>
import math

import jax
import jax.numpy as jnp
from jax.experimental import pallas as pl
from jax.experimental.pallas import tpu as pltpu


def _perturbation_kernel(x_ref, p_ref, o_ref):
    # x_ref: (TB, L) activation tile; p_ref: (3, L) f32 resident params
    # (rows = lane-folded copies of s, t, clip), broadcast over the row axis.
    x = x_ref[...].astype(jnp.float32)          # scale/shift/clip in f32
    p = p_ref[...]
    y = jnp.minimum(p[0] * x + p[1], p[2])
    o_ref[...] = y.astype(o_ref.dtype)


def _round_up(a, m):
    return ((a + m - 1) // m) * m


def _tpu_budgets():
    """Generation-aware (tile bytes, vmem cap) derived from physical VMEM size."""
    vmem_cap = 128 << 20
    try:
        vmem_cap = int(pltpu.get_tpu_info().vmem_capacity_bytes)
    except Exception:
        pass
    if vmem_cap <= (64 << 20):
        # v7x: 64 MiB physical per TC, ~1.6 TB/s per-TC HBM -> bigger tiles,
        # cap well below physical to leave Mosaic scratch headroom.
        return 4 << 20, min(48 << 20, (vmem_cap * 3) // 4)
    # v5e / v6e: 128 MiB physical VMEM; 2 MiB tiles already sit on the roofline.
    return 2 << 20, 64 << 20


def perturbation_layer(x, s, t, clip, *,
                       target_lane_width=1024,
                       min_pallas_bytes=256 << 10):
    """out = minimum(s * x + t, clip) with (size,) params broadcast over x[..., size]."""
    orig_shape = x.shape
    F = orig_shape[-1]
    itemsize = jnp.dtype(x.dtype).itemsize

    # Small-input fallback: launch overhead dominates, let XLA fuse it.
    if x.size * itemsize < min_pallas_bytes:
        y = jnp.minimum(s.astype(jnp.float32) * x.astype(jnp.float32)
                        + t.astype(jnp.float32), clip.astype(jnp.float32))
        return y.astype(x.dtype).reshape(orig_shape)

    x2 = x.reshape(-1, F)
    B = x2.shape[0]

    sublane = {4: 8, 2: 16, 1: 32}.get(itemsize, 8)  # dtype-aware row-tile granularity

    # Generalized lane folding: pack R rows into the lane dim (free row-major
    # reshape) with (R*F) % 128 == 0 and B % R == 0, targeting ~target_lane_width
    # lanes.  Gives unmasked lane-dense stores even for F=32/64/96/... .
    R = 1
    if B > 1 and F < target_lane_width:
        r0 = 128 // math.gcd(F, 128)                  # smallest fold giving 128-aligned lanes
        max_mult = max(1, target_lane_width // (r0 * F))
        for m in range(max_mult, 0, -1):
            cand = m * r0
            if cand <= B and B % cand == 0:
                R = cand
                break
    L = R * F
    xf = x2.reshape(B // R, L)
    Bf = xf.shape[0]

    # Params: single (3, L) f32 block, resident in VMEM across all grid steps.
    params = jnp.stack([
        jnp.tile(s.astype(jnp.float32), (R,)),
        jnp.tile(t.astype(jnp.float32), (R,)),
        jnp.tile(clip.astype(jnp.float32), (R,)),
    ], axis=0)

    target_tile_bytes, vmem_cap = _tpu_budgets()

    # Row tile targeting ~target_tile_bytes per block.
    tb = max(sublane, (target_tile_bytes // max(1, L * itemsize)) // sublane * sublane)
    if Bf <= sublane:
        tb = Bf                                       # full extent -> always a legal block
    elif tb >= Bf:
        # Whole batch would be one block: split into >=4 steps so each TensorCore
        # gets >=2 pipelined iterations (read/write DMA overlap).
        tb = max(sublane, _round_up(pl.cdiv(Bf, 4), sublane))
    grid = pl.cdiv(Bf, tb)                            # ragged last block is masked by Pallas

    tile_bytes = tb * L * itemsize
    # 2 buffers for x + 2 for out + resident params + headroom; only as much as needed.
    vmem_need = 4 * tile_bytes + 2 * 3 * L * 4 + (2 << 20)
    vmem_limit = int(min(max(vmem_need, 8 << 20), vmem_cap))

    out = pl.pallas_call(
        _perturbation_kernel,
        out_shape=jax.ShapeDtypeStruct((Bf, L), x.dtype),
        grid_spec=pltpu.PrefetchScalarGridSpec(
            num_scalar_prefetch=0,
            grid=(grid,),
            in_specs=[
                pl.BlockSpec((tb, L), lambda i: (i, 0)),   # x tile walks the row axis
                pl.BlockSpec((3, L), lambda i: (0, 0)),    # packed s/t/clip (resident)
            ],
            out_specs=pl.BlockSpec((tb, L), lambda i: (i, 0)),
        ),
        compiler_params=pltpu.CompilerParams(
            dimension_semantics=("parallel",),
            vmem_limit_bytes=vmem_limit,
        ),
    )(xf, params)

    return out.reshape(orig_shape)


if __name__ == "__main__":
    key = jax.random.PRNGKey(0)
    kx, ks, kt, kx3 = jax.random.split(key, 4)

    # Case 1: default module parameters (s=1, t=0, clip=+inf); tiny input goes
    # through the small-input fallback path.
    size = 128
    batch = 16
    x = jax.random.normal(kx, (batch, size), dtype=jnp.float32)
    s0 = jnp.ones((size,), dtype=jnp.float32)
    t0 = jnp.zeros((size,), dtype=jnp.float32)
    c0 = jnp.full((size,), jnp.inf, dtype=jnp.float32)
    out0 = jax.block_until_ready(perturbation_layer(x, s0, t0, c0))
    ref0 = jnp.minimum(s0[None, :] * x + t0[None, :], c0[None, :])
    assert out0.shape == x.shape and out0.dtype == x.dtype
    assert jnp.allclose(out0, ref0, atol=1e-6, rtol=1e-6)

    # Case 2: non-trivial params, force the Pallas path (lane-folded, grid=1).
    s1 = jax.random.normal(ks, (size,), dtype=jnp.float32)
    t1 = jax.random.normal(kt, (size,), dtype=jnp.float32)
    c1 = jnp.full((size,), 0.5, dtype=jnp.float32)
    out1 = jax.block_until_ready(
        perturbation_layer(x, s1, t1, c1, min_pallas_bytes=0))
    ref1 = jnp.minimum(s1[None, :] * x + t1[None, :], c1[None, :])
    assert jnp.allclose(out1, ref1, atol=1e-6, rtol=1e-6)

    # Case 3: feature size not a multiple of 128 (F=96 -> R=8 fold) with a
    # multi-step ragged grid, forced through the Pallas path.
    size3, batch3 = 96, 400
    x3 = jax.random.normal(kx3, (batch3, size3), dtype=jnp.float32)
    s3 = jnp.linspace(-1.0, 1.0, size3, dtype=jnp.float32)
    t3 = jnp.linspace(0.5, -0.5, size3, dtype=jnp.float32)
    c3 = jnp.full((size3,), 0.25, dtype=jnp.float32)
    out3 = jax.block_until_ready(
        perturbation_layer(x3, s3, t3, c3, min_pallas_bytes=0))
    ref3 = jnp.minimum(s3[None, :] * x3 + t3[None, :], c3[None, :])
    assert out3.shape == x3.shape
    assert jnp.allclose(out3, ref3, atol=1e-6, rtol=1e-6)

    print("KERNEL_OK")
</pallas_src>

<mosaic_0001>
module attributes {stable_mosaic.version = 11 : i64} {
  func.func @_perturbation_kernel(%arg0: i32, %arg1: memref<2x1024xf32, #tpu.memory_space<vmem>>, %arg2: memref<3x1024xf32, #tpu.memory_space<vmem>>, %arg3: memref<2x1024xf32, #tpu.memory_space<vmem>>) attributes {dimension_semantics = [#tpu.dimension_semantics<parallel>], iteration_bounds = array<i64: 1>, scalar_prefetch = 0 : i64, scratch_operands = 0 : i64, tpu.core_type = #tpu.core_type<tc>, window_params = [{transform_indices = @transform_0, window_bounds = array<i64: 2, 1024>}, {pipeline_mode = #tpu.pipeline_mode<synchronous>, transform_indices = @transform_1, window_bounds = array<i64: 3, 1024>}, {transform_indices = @transform_2, window_bounds = array<i64: 2, 1024>}]} {
    %c0 = arith.constant 0 : index
    %c0_0 = arith.constant 0 : index
    %0 = vector.load %arg1[%c0, %c0_0] : memref<2x1024xf32, #tpu.memory_space<vmem>>, vector<2x1024xf32>
    %c0_1 = arith.constant 0 : index
    %c0_2 = arith.constant 0 : index
    %1 = vector.load %arg2[%c0_1, %c0_2] : memref<3x1024xf32, #tpu.memory_space<vmem>>, vector<3x1024xf32>
    %2 = vector.extract_strided_slice %1 {offsets = [0, 0], sizes = [1, 1024], strides = [1, 1]} : vector<3x1024xf32> to vector<1x1024xf32>
    %3 = vector.shape_cast %2 : vector<1x1024xf32> to vector<1024xf32>
    %4 = vector.shape_cast %3 : vector<1024xf32> to vector<1x1024xf32>
    %5 = vector.broadcast %4 : vector<1x1024xf32> to vector<2x1024xf32>
    %6 = arith.mulf %5, %0 : vector<2x1024xf32>
    %7 = vector.extract_strided_slice %1 {offsets = [1, 0], sizes = [1, 1024], strides = [1, 1]} : vector<3x1024xf32> to vector<1x1024xf32>
    %8 = vector.shape_cast %7 : vector<1x1024xf32> to vector<1024xf32>
    %9 = vector.shape_cast %8 : vector<1024xf32> to vector<1x1024xf32>
    %10 = vector.broadcast %9 : vector<1x1024xf32> to vector<2x1024xf32>
    %11 = arith.addf %6, %10 : vector<2x1024xf32>
    %12 = vector.extract_strided_slice %1 {offsets = [2, 0], sizes = [1, 1024], strides = [1, 1]} : vector<3x1024xf32> to vector<1x1024xf32>
    %13 = vector.shape_cast %12 : vector<1x1024xf32> to vector<1024xf32>
    %14 = vector.shape_cast %13 : vector<1024xf32> to vector<1x1024xf32>
    %15 = vector.broadcast %14 : vector<1x1024xf32> to vector<2x1024xf32>
    %16 = arith.minimumf %11, %15 : vector<2x1024xf32>
    %c0_3 = arith.constant 0 : index
    %c0_4 = arith.constant 0 : index
    %17 = vector.load %arg3[%c0_3, %c0_4] : memref<2x1024xf32, #tpu.memory_space<vmem>>, vector<2x1024xf32>
    tpu.vector_store %arg3[%c0_3, %c0_4], %16 {strides = array<i32>} : memref<2x1024xf32, #tpu.memory_space<vmem>>, vector<2x1024xf32>,
    return
  }
  func.func @transform_0(%arg0: i32) -> (i32, i32) {
    %c0_i32 = arith.constant 0 : i32
    %c0_i32_0 = arith.constant 0 : i32
    return %arg0, %c0_i32 : i32, i32
  }
  func.func @transform_1(%arg0: i32) -> (i32, i32) {
    %c0_i32 = arith.constant 0 : i32
    %c0_i32_0 = arith.constant 0 : i32
    %c0_i32_1 = arith.constant 0 : i32
    return %c0_i32, %c0_i32_0 : i32, i32
  }
  func.func @transform_2(%arg0: i32) -> (i32, i32) {
    %c0_i32 = arith.constant 0 : i32
    %c0_i32_0 = arith.constant 0 : i32
    return %arg0, %c0_i32 : i32, i32
  }
}

</mosaic_0001>

<bundles_post_ra>
// kernel: tpu_custom_call.1
= control target key start
LH: loop header
LB: loop body
LE: loop exit
PB: predicated region body
PF: predicated region fallthrough
CT: control target
= control target key end

     0   :  { %7 = vsyncpa [#allocation3], 0  ;;  %s575_s0 = inlined_call_operand.hbm [shape: f32[2,1024], index: 0, kind: input, shape index: {}]   ;;  %s576_s1 = inlined_call_operand.hbm [shape: f32[3,1024], index: 1, kind: input, shape index: {}]   ;;  %s577_s2 = inlined_call_operand.hbm [shape: f32[2,1024], index: 2, kind: output, shape index: {}]  }
   0x1   :  { %8 = vsyncpa [#allocation6], 0 }
   0x2   :  { %9 = vsyncpa [#allocation4], 0  ;;  %s470_s9 = smov [#allocation2]   ;;  %s471_s11 = smov [#allocation5]  }
   0x3   :  { %s16_s10 = sshll.u32 %s470_s9, 4  ;;  %s26_s12 = sshll.u32 %s471_s11, 4  ;;  %s17_s10 = int_to_ptr.vmem [resolvable:$true] %s16_s10  ;;  %s27_s12 = int_to_ptr.vmem [resolvable:$true] %s26_s12 }
   0x4   :  { %s398_s15 = scalar_lea.hbm %s575_s0, 256 }
   0x5   :  { %p399_p0 = scmp.ne.s32.totalorder %s575_s0, %s398_s15  ;;  %p402_p1 = scmp.lt.u32.totalorder %s398_s15, %s575_s0 }
   0x7   :  { %p404_p2 = pnand %p402_p1, %p399_p0 }
   0x9   :  { %407 = shalt.err (!%p404_p2)
}
   0xa   :  { %s408_s20 = scalar_lea.vmem %s17_s10, 256  ;;  %p413_p4 = scmp.lt.s32.totalorder %s17_s10, %s17_s10 }
   0xb   :  { %p409_p3 = scmp.ne.s32.totalorder %s17_s10, %s408_s20  ;;  %p414_p5 = scmp.lt.s32.totalorder %s408_s20, %s408_s20 }
   0xd   :  { %p415_p6 = por %p414_p5, %p413_p4 }
   0xf   :  { %p416_p7 = pnand %p415_p6, %p409_p3 }
  0x11   :  { %419 = shalt.err (!%p416_p7)
}
  0x12   :  { %19 = dma.hbm_to_vmem [thread:$0]  %s575_s0, 256, %s17_s10, [#allocation3]  }
  0x13   :  { %s420_s25 = scalar_lea.hbm %s576_s1, 512 }
  0x14   :  { %p421_p8 = scmp.ne.s32.totalorder %s576_s1, %s420_s25  ;;  %p424_p9 = scmp.lt.u32.totalorder %s420_s25, %s576_s1 }
  0x16   :  { %p426_p10 = pnand %p424_p9, %p421_p8 }
  0x18   :  { %429 = shalt.err (!%p426_p10)
}
  0x19   :  { %s430_s30 = scalar_lea.vmem %s27_s12, 512  ;;  %p435_p12 = scmp.lt.s32.totalorder %s27_s12, %s27_s12 }
  0x1a   :  { %p431_p11 = scmp.ne.s32.totalorder %s27_s12, %s430_s30  ;;  %p436_p13 = scmp.lt.s32.totalorder %s430_s30, %s430_s30 }
  0x1c   :  { %p437_p0 = por %p436_p13, %p435_p12 }
  0x1e   :  { %p438_p1 = pnand %p437_p0, %p431_p11 }
  0x20   :  { %441 = shalt.err (!%p438_p1)
}
  0x21   :  { %29 = dma.hbm_to_vmem [thread:$0]  %s576_s1, 512, %s27_s12, [#allocation6]  }
  0x22   :  { %464 = dma.done.wait [#allocation3], 256  }
  0x23   :  { %465 = vsyncadd [#allocation3], 4294967040 }
  0x24   :  { %466 = dma.done.wait [#allocation6], 512  }
  0x25   :  { %467 = vsyncadd [#allocation6], 4294966784  ;;  %v46_v0 = vlaneseq  ;;  %v472_v1 = vmov 1983009808   ;;  %v36_v11 = vld [vmem:[#allocation2] sm:$0xff]  ;;  %v37_v55 = vld [vmem:[#allocation2 + $0x8] sm:$0xff] }
  0x26   :  { %v122_v2 = vunpack.c.l.s4 %v472_v1  ;;  %v38_v12 = vld [vmem:[#allocation5] sm:$0x77]  ;;  %v39_v13 = vld [vmem:[#allocation5 + $0x8] sm:$0x77]  ;;  %v120_v19 = vcombine.high %v36_v11, %v36_v11  ;;  %v40_v39 = vld [vmem:[#allocation5 + $0x10] sm:$0x77] }
  0x27   :  { %v47_v3 = vshrl.u32 %v46_v0, 7  ;;  %v41_v44 = vld [vmem:[#allocation5 + $0x18] sm:$0x77]  ;;  %s473_s1 = smov [#allocation7]  }
  0x28   :  { %v123_v4 = vunpack.c.0.s8 %v122_v2  ;;  %s382_s4 = sshll.u32 %s473_s1, 4  ;;  %s383_s4 = int_to_ptr.vmem [resolvable:$true] %s382_s4 }
  0x29   :  { %v48_v5 = vsub.s32 0, %v47_v3  ;;  %v52_v6 = vsub.s32 4, %v47_v3  ;;  %v515_v8 = vsub.s32 1, %v47_v3  ;;  %v517_v9 = vsub.s32 5, %v47_v3  ;;  %s442_s5 = scalar_lea.vmem %s383_s4, 256  ;;  %p447_p3 = scmp.lt.s32.totalorder %s383_s4, %s383_s4 }
  0x2a   :  { %v513_v7 = vsub.s32 %v123_v4, %v47_v3  ;;  %v519_v10 = vsub.s32 2, %v47_v3  ;;  %v521_v14 = vsub.s32 6, %v47_v3  ;;  %v137_v4 = vcombine.high %v37_v55, %v37_v55  ;;  %p443_p2 = scmp.ne.s32.totalorder %s383_s4, %s442_s5  ;;  %p448_p4 = scmp.lt.s32.totalorder %s442_s5, %s442_s5 }
  0x2b   :  { %v49_v15 = vrot.slane %v38_v12, %v48_v5  ;;  %v53_v16 = vrot.slane %v38_v12, %v52_v6  ;;  %v57_v17 = vrot.slane %v39_v13, %v48_v5  ;;  %v61_v18 = vrot.slane %v39_v13, %v52_v6 }
  0x2c   :  { %v127_v20 = vrot.slane %v36_v11, %v513_v7  ;;  %v173_v21 = vrot.slane %v38_v12, %v515_v8  ;;  %v177_v22 = vrot.slane %v38_v12, %v517_v9  ;;  %v134_v27 = vrot.slane %v120_v19, %v513_v7  ;;  %p449_p5 = por %p448_p4, %p447_p3 }
  0x2d   :  { %v89_v23 = vrot.slane %v49_v15, %v48_v5  ;;  %v93_v24 = vrot.slane %v53_v16, %v48_v5  ;;  %v97_v25 = vrot.slane %v57_v17, %v48_v5  ;;  %v101_v26 = vrot.slane %v61_v18, %v48_v5 }
  0x2e   :  { %v135_v28 = vcombine.high %v127_v20, %v127_v20  ;;  %v181_v29 = vrot.slane %v39_v13, %v515_v8  ;;  %v185_v30 = vrot.slane %v39_v13, %v517_v9  ;;  %v213_v32 = vrot.slane %v173_v21, %v515_v8  ;;  %p450_p6 = pnand %p449_p5, %p443_p2 }
  0x2f   :  { %v162_v31 = vmul.f32 %v127_v20, %v89_v23  ;;  %v217_v33 = vrot.slane %v177_v22, %v515_v8  ;;  %v253_v34 = vrot.slane %v38_v12, %v519_v10  ;;  %v136_v35 = vcombine.high %v134_v27, %v134_v27 }
  0x30   :  { %v163_v36 = vmul.f32 %v135_v28, %v93_v24  ;;  %v164_v37 = vmul.f32 %v134_v27, %v97_v25  ;;  %v221_v38 = vrot.slane %v181_v29, %v515_v8  ;;  %v225_v40 = vrot.slane %v185_v30, %v515_v8 }
  0x31   :  { %v242_v41 = vadd.f32 %v213_v32, %v162_v31  ;;  %v257_v42 = vrot.slane %v38_v12, %v521_v14  ;;  %v261_v43 = vrot.slane %v39_v13, %v519_v10  ;;  %v165_v45 = vmul.f32 %v136_v35, %v101_v26 }
  0x32   :  { %v243_v46 = vadd.f32 %v217_v33, %v163_v36  ;;  %v244_v47 = vadd.f32 %v221_v38, %v164_v37  ;;  %v265_v48 = vrot.slane %v39_v13, %v521_v14  ;;  %v293_v49 = vrot.slane %v253_v34, %v519_v10 }
  0x33   :  { %v297_v50 = vrot.slane %v257_v42, %v519_v10  ;;  %v301_v51 = vrot.slane %v261_v43, %v519_v10  ;;  %v65_v52 = vrot.slane %v40_v39, %v48_v5  ;;  %v245_v53 = vadd.f32 %v225_v40, %v165_v45 }
  0x34   :  { %v305_v54 = vrot.slane %v265_v48, %v519_v10  ;;  %v69_v56 = vrot.slane %v40_v39, %v52_v6  ;;  %v73_v57 = vrot.slane %v41_v44, %v48_v5  ;;  %v322_v58 = vmin.f32 %v242_v41, %v293_v49 }
  0x35   :  { %v323_v59 = vmin.f32 %v243_v46, %v297_v50  ;;  %v324_v60 = vmin.f32 %v244_v47, %v301_v51  ;;  %v77_v61 = vrot.slane %v41_v44, %v52_v6  ;;  %v105_v63 = vrot.slane %v65_v52, %v48_v5 }
  0x36   :  { %v325_v62 = vmin.f32 %v245_v53, %v305_v54  ;;  %v109_v0 = vrot.slane %v69_v56, %v48_v5  ;;  %v113_v1 = vrot.slane %v73_v57, %v48_v5  ;;  %v144_v11 = vrot.slane %v37_v55, %v513_v7 }
  0x37   :  { %v338_v2 = vcombine.low %v322_v58, %v323_v59  ;;  %v117_v3 = vrot.slane %v77_v61, %v48_v5  ;;  %v189_v13 = vrot.slane %v40_v39, %v515_v8  ;;  %v193_v15 = vrot.slane %v40_v39, %v517_v9 }
  0x38   :  { %v339_v12 = vcombine.low %v324_v60, %v325_v62  ;;  %v197_v16 = vrot.slane %v41_v44, %v515_v8  ;;  %v151_v6 = vrot.slane %v137_v4, %v513_v7  ;;  %v152_v18 = vcombine.high %v144_v11, %v144_v11 }
  0x39   :  { %v346_v17 = vrot.slane %v338_v2, %v513_v7  ;;  %v166_v19 = vmul.f32 %v144_v11, %v105_v63  ;;  %v201_v5 = vrot.slane %v41_v44, %v517_v9  ;;  %v229_v21 = vrot.slane %v189_v13, %v515_v8 }
  0x3a   :  { %v353_v20 = vrot.slane %v339_v12, %v513_v7  ;;  %v233_v22 = vrot.slane %v193_v15, %v515_v8  ;;  %v153_v23 = vcombine.high %v151_v6, %v151_v6  ;;  %v167_v24 = vmul.f32 %v152_v18, %v109_v0 }
  0x3b   :  { %v168_v25 = vmul.f32 %v151_v6, %v113_v1  ;;  %v237_v26 = vrot.slane %v197_v16, %v515_v8  ;;  %v241_v28 = vrot.slane %v201_v5, %v515_v8  ;;  %v246_v29 = vadd.f32 %v229_v21, %v166_v19 }
  0x3c   :  { %v354_v27 = vcombine.low %v346_v17, %v353_v20  ;;  %v269_v30 = vrot.slane %v40_v39, %v519_v10  ;;  %v169_v31 = vmul.f32 %v153_v23, %v117_v3  ;;  %v247_v32 = vadd.f32 %v233_v22, %v167_v24 }
  0x3d   :  { %v273_v33 = vrot.slane %v40_v39, %v521_v14  ;;  %v248_v9 = vadd.f32 %v237_v26, %v168_v25  ;;  %v277_v34 = vrot.slane %v41_v44, %v519_v10  ;;  %v281_v35 = vrot.slane %v41_v44, %v521_v14 }
  0x3e   :  { %374 = vst [vmem:[#allocation7] sm:$0xff] %v354_v27  ;;  %v309_v36 = vrot.slane %v269_v30, %v519_v10  ;;  %v249_v37 = vadd.f32 %v241_v28, %v169_v31 }
  0x3f   :  { %v313_v38 = vrot.slane %v273_v33, %v519_v10  ;;  %v317_v8 = vrot.slane %v277_v34, %v519_v10  ;;  %v321_v40 = vrot.slane %v281_v35, %v519_v10 }
  0x40   :  { %v326_v41 = vmin.f32 %v246_v29, %v309_v36 }
  0x41   :  { %v327_v42 = vmin.f32 %v247_v32, %v313_v38  ;;  %v328_v43 = vmin.f32 %v248_v9, %v317_v8  ;;  %v329_v45 = vmin.f32 %v249_v37, %v321_v40 }
  0x43   :  { %v355_v39 = vcombine.low %v326_v41, %v327_v42  ;;  %v356_v46 = vcombine.low %v328_v43, %v329_v45 }
  0x45   :  { %v363_v47 = vrot.slane %v355_v39, %v513_v7  ;;  %v370_v14 = vrot.slane %v356_v46, %v513_v7 }
  0x47   :  { %v371_v44 = vcombine.low %v363_v47, %v370_v14 }
  0x49   :  { %375 = vst [vmem:[#allocation7 + $0x8] sm:$0xff] %v371_v44 }
  0x4a   :  { %453 = shalt.err (!%p450_p6)
}
  0x4b   :  { %s454_s8 = scalar_lea.hbm %s577_s2, 256 }
  0x4c   :  { %p455_p7 = scmp.ne.s32.totalorder %s577_s2, %s454_s8  ;;  %p458_p8 = scmp.lt.u32.totalorder %s454_s8, %s577_s2 }
  0x4e   :  { %p460_p9 = pnand %p458_p8, %p455_p7 }
  0x50   :  { %463 = shalt.err (!%p460_p9)
}
  0x51   :  { %385 = dma.vmem_to_hbm [thread:$0]  %s383_s4, 256, %s577_s2, [#allocation4]  }
  0x52   :  { %468 = dma.done.wait [#allocation4], 256  }
  0x53   :  { %469 = vsyncadd [#allocation4], 4294967040 }
  0x54   :  { %389 = vsyncpa [#allocation3], 1 }
  0x55   :  { %390 = vsyncpa [#allocation6], 1 }
  0x56   :  { %391 = vsyncpa [#allocation4], 1 }

</bundles_post_ra>
